<compile_context>
chip_gen: v7x
topology: tpu7x:2x2x1
jax: 0.10.0
libtpu: 0.0.40
codegen_flags: <defaults>
</compile_context>

<pallas_src>
import jax
import jax.numpy as jnp
from jax import lax
from jax.experimental import pallas as pl
from jax.experimental.pallas import tpu as pltpu

IN_F, H1, H2, OUT_F = 6, 16, 8, 1


def mlp_kernel(x_ref, w_ref, b_ref, o_ref):
    # x_ref: (tile, 6)  batch-major block   (primary path), or
    #        (6, tile)  feature-major block (fallback path).
    # w_ref: (3, 16, 16) packed weights, resident in VMEM across all grid steps.
    # b_ref: (3, 16, 1)  packed biases.
    # o_ref: (1, tile)   lane-dense output (batch on lanes).
    w1 = w_ref[0, :, :IN_F]                                      # (16, 6)
    b1 = b_ref[0]                                                # (16, 1) -> lane broadcast

    if x_ref.shape[0] == IN_F:
        # Feature-major block (6, tile): batch already on lanes.
        xT = x_ref[...].astype(jnp.float32)
        h1 = jnp.dot(w1, xT, preferred_element_type=jnp.float32) + b1
    else:
        # Batch-major block (tile, 6): contract over the lane (feature) axis of BOTH
        # operands -> h1[f, n] = sum_k w1[f, k] * x[n, k].  This is the standard
        # transposed-RHS (q @ k.T) matmul pattern; the MXU handles the batch->lane
        # transpose, so no wrapper-side x.T / jnp.pad HBM round trip is needed.
        x = x_ref[...].astype(jnp.float32)
        h1 = lax.dot_general(w1, x, (((1,), (1,)), ((), ())),
                             preferred_element_type=jnp.float32) + b1

    h1 = jnp.maximum(h1, 0.0)                                    # (16, tile)

    # Layer 2: (8,16) @ (16,tile) -> (8,tile), batch stays on lanes.
    w2 = w_ref[1, :H2, :]                                        # (8, 16)
    b2 = b_ref[1, :H2, :]                                        # (8, 1)
    h2 = jnp.maximum(jnp.dot(w2, h1, preferred_element_type=jnp.float32) + b2, 0.0)

    # Layer 3: (1,8) @ (8,tile) as VPU multiply + sublane-sum (no width-1 matmul).
    w3_col = w_ref[2, :H2, 0:1]                                  # (8, 1) == W3^T
    b3 = b_ref[2, 0:1, :]                                        # (1, 1)
    out = jnp.sum(h2 * w3_col, axis=0, keepdims=True) + b3       # (1, tile), lane-dense
    o_ref[...] = out.astype(o_ref.dtype)


def pack_params(p):
    """Pack PyTorch-convention params (W: (out,in), b: (out,)) into two small arrays."""
    w = jnp.zeros((3, 16, 16), jnp.float32)
    w = w.at[0, :H1, :IN_F].set(p["w1"])
    w = w.at[1, :H2, :H1].set(p["w2"])
    w = w.at[2, :H2, 0].set(p["w3"][0, :])        # W3 stored transposed as a column
    b = jnp.zeros((3, 16, 1), jnp.float32)
    b = b.at[0, :H1, 0].set(p["b1"])
    b = b.at[1, :H2, 0].set(p["b2"])
    b = b.at[2, 0, 0].set(p["b3"][0])
    return w, b


def _pick_batch_tile(B, *, max_tile, min_steps=8):
    """Rows per grid step: as big as VMEM allows, but keep >= min_steps grid steps so the
    parallel batch axis load-balances v7x's two TensorCores."""
    t = min(max_tile, pl.cdiv(B, min_steps))
    t = ((t + 127) // 128) * 128                  # lane/sublane alignment
    return max(t, 128)


def runtime_predictor(x, params, *, batch_tile=None, pallas_min_batch=512):
    """x: (B, 6) float32 or bfloat16 -> (B, 1) float32, matching RuntimePredictor.forward."""
    B, Din = x.shape
    assert Din == IN_F
    if x.dtype not in (jnp.dtype(jnp.float32), jnp.dtype(jnp.bfloat16)):
        x = x.astype(jnp.float32)

    if B < pallas_min_batch:
        # Tiny batch: pallas_call launch cost dominates; XLA's fused dots are optimal.
        x32 = x.astype(jnp.float32)
        h = jnp.maximum(x32 @ params["w1"].T + params["b1"], 0.0)
        h = jnp.maximum(h @ params["w2"].T + params["b2"], 0.0)
        return h @ params["w3"].T + params["b3"]

    if batch_tile is not None:
        assert batch_tile % 128 == 0, "batch_tile must be a multiple of 128"

    w_pack, b_pack = pack_params(params)

    def call(x_arr, tile, feature_major):
        if feature_major:
            x_spec = pl.BlockSpec((IN_F, tile), lambda i: (0, i))   # (6, tile), batch on lanes
        else:
            x_spec = pl.BlockSpec((tile, IN_F), lambda i: (i, 0))   # (tile, 6), native layout
        return pl.pallas_call(
            mlp_kernel,
            out_shape=jax.ShapeDtypeStruct((1, B), jnp.float32),
            grid_spec=pltpu.PrefetchScalarGridSpec(
                num_scalar_prefetch=0,
                grid=(pl.cdiv(B, tile),),          # cdiv grid: ragged tail, no full-array pad
                in_specs=[
                    x_spec,
                    # Constant index_maps -> weights/biases stay resident in VMEM; Pallas
                    # does not re-copy unchanged blocks (Buffered(1) would only save ~25 KiB).
                    pl.BlockSpec((3, 16, 16), lambda i: (0, 0, 0)),
                    pl.BlockSpec((3, 16, 1), lambda i: (0, 0, 0)),
                ],
                out_specs=pl.BlockSpec((1, tile), lambda i: (0, i)),   # lane-dense store
            ),
            compiler_params=pltpu.CompilerParams(
                dimension_semantics=("parallel",),          # batch axis; shardable on v7x 2 TCs
                vmem_limit_bytes=32 * 1024 * 1024,          # <= defaults/physical on v5e/v6e/v7x
            ),
        )(x_arr, w_pack, b_pack)

    try:
        # Primary: consume (B, 6) directly -> no extra HBM pass for transpose/pad.
        # Batch-major x blocks live padded to 128 lanes in VMEM (~512 B/row f32), so cap
        # the tile at 8192 rows (~10-15 MiB total incl. double buffering).
        tile = batch_tile or _pick_batch_tile(B, max_tile=8192)
        out = call(x, tile, feature_major=False)
    except Exception:
        # Toolchain guard: if the transposed-RHS dot_general does not lower on this
        # jax/Mosaic version, fall back to the proven feature-major layout (one extra
        # HBM pass for x.T; VMEM is dense there so much larger tiles are fine).
        tile = batch_tile or _pick_batch_tile(B, max_tile=32768)
        out = call(x.T, tile, feature_major=True)

    # (1, B) -> (B, 1) is a pure row-major reshape (tiny, layout-compatible).
    return out.reshape(B, 1)


def init_params(key):
    """Deterministic init mimicking PyTorch Linear defaults (uniform +-1/sqrt(fan_in))."""
    ks = jax.random.split(key, 6)

    def linear(kw, kb, fan_in, fan_out):
        bound = 1.0 / (fan_in ** 0.5)
        w = jax.random.uniform(kw, (fan_out, fan_in), jnp.float32, -bound, bound)
        b = jax.random.uniform(kb, (fan_out,), jnp.float32, -bound, bound)
        return w, b

    w1, b1 = linear(ks[0], ks[1], IN_F, H1)
    w2, b2 = linear(ks[2], ks[3], H1, H2)
    w3, b3 = linear(ks[4], ks[5], H2, OUT_F)
    return dict(w1=w1, b1=b1, w2=w2, b2=b2, w3=w3, b3=b3)


def reference(x, p):
    h = jnp.maximum(x @ p["w1"].T + p["b1"], 0.0)
    h = jnp.maximum(h @ p["w2"].T + p["b2"], 0.0)
    return h @ p["w3"].T + p["b3"]


if __name__ == "__main__":
    key = jax.random.PRNGKey(0)
    kp, kx1, kx2 = jax.random.split(key, 3)
    params = init_params(kp)

    # 1) Tiny batch implied by the module (batch=8, features=6): jnp fast path (per review).
    x_small = jax.random.normal(kx1, (8, IN_F), jnp.float32)
    out_small = jax.block_until_ready(runtime_predictor(x_small, params))
    assert out_small.shape == (8, 1)
    assert jnp.allclose(out_small, reference(x_small, params), atol=1e-3, rtol=1e-3), \
        "small-batch mismatch"

    # 2) Pallas path: 2000 rows -> adaptive tile (256 rows/step), cdiv grid of 8 steps with a
    #    masked ragged tail; no wrapper-side transpose or pad.
    x_big = jax.random.normal(kx2, (2000, IN_F), jnp.float32)
    out_big = jax.block_until_ready(runtime_predictor(x_big, params))
    ref_big = reference(x_big, params)
    assert out_big.shape == (2000, 1)
    assert jnp.allclose(out_big, ref_big, atol=1e-3, rtol=1e-3), "pallas path mismatch"

    # 3) bf16-input path (halves the dominant HBM stream; f32 accumulation inside the kernel).
    x_bf16 = x_big.astype(jnp.bfloat16)
    out_bf16 = jax.block_until_ready(runtime_predictor(x_bf16, params))
    ref_bf16 = reference(x_bf16.astype(jnp.float32), params)
    assert out_bf16.shape == (2000, 1)
    assert jnp.allclose(out_bf16, ref_bf16, atol=1e-2, rtol=1e-2), "bf16 path mismatch"

    print("KERNEL_OK")
</pallas_src>

<mosaic_0001>
module attributes {stable_mosaic.version = 11 : i64} {
  func.func @mlp_kernel(%arg0: i32, %arg1: memref<256x6xf32, #tpu.memory_space<vmem>>, %arg2: memref<3x16x16xf32, #tpu.memory_space<vmem>>, %arg3: memref<3x16x1xf32, #tpu.memory_space<vmem>>, %arg4: memref<1x256xf32, #tpu.memory_space<vmem>>) attributes {dimension_semantics = [#tpu.dimension_semantics<parallel>], iteration_bounds = array<i64: 8>, scalar_prefetch = 0 : i64, scratch_operands = 0 : i64, tpu.core_type = #tpu.core_type<tc>, window_params = [{transform_indices = @transform_0, window_bounds = array<i64: 256, 6>}, {pipeline_mode = #tpu.pipeline_mode<synchronous>, transform_indices = @transform_1, window_bounds = array<i64: 3, 16, 16>}, {pipeline_mode = #tpu.pipeline_mode<synchronous>, transform_indices = @transform_2, window_bounds = array<i64: 3, 16, 1>}, {transform_indices = @transform_3, window_bounds = array<i64: 1, 256>}]} {
    %c0 = arith.constant 0 : index
    %c0_0 = arith.constant 0 : index
    %c0_1 = arith.constant 0 : index
    %0 = vector.load %arg2[%c0, %c0_0, %c0_1] : memref<3x16x16xf32, #tpu.memory_space<vmem>>, vector<1x16x6xf32>
    %1 = vector.shape_cast %0 : vector<1x16x6xf32> to vector<16x6xf32>
    %c0_2 = arith.constant 0 : index
    %c0_3 = arith.constant 0 : index
    %c0_4 = arith.constant 0 : index
    %2 = vector.load %arg3[%c0_2, %c0_3, %c0_4] : memref<3x16x1xf32, #tpu.memory_space<vmem>>, vector<1x16x1xf32>
    %3 = vector.shape_cast %2 : vector<1x16x1xf32> to vector<16x1xf32>
    %c0_5 = arith.constant 0 : index
    %c0_6 = arith.constant 0 : index
    %4 = vector.load %arg1[%c0_5, %c0_6] : memref<256x6xf32, #tpu.memory_space<vmem>>, vector<256x6xf32>
    %cst = arith.constant dense<0.000000e+00> : vector<16x256xf32>
    %5 = tpu.matmul %1, %4, %cst {dimension_numbers = #tpu.dot_dimension_numbers<[1], [1], [0], [0], [0, 0, 1, 0], [], []>} : vector<16x6xf32>, vector<256x6xf32>, vector<16x256xf32> -> vector<16x256xf32>
    %6 = vector.broadcast %3 : vector<16x1xf32> to vector<16x256xf32>
    %7 = arith.addf %5, %6 : vector<16x256xf32>
    %cst_7 = arith.constant 0.000000e+00 : f32
    %8 = vector.broadcast %cst_7 : f32 to vector<16x256xf32>
    %9 = arith.maximumf %7, %8 : vector<16x256xf32>
    %c1 = arith.constant 1 : index
    %c0_8 = arith.constant 0 : index
    %c0_9 = arith.constant 0 : index
    %10 = vector.load %arg2[%c1, %c0_8, %c0_9] : memref<3x16x16xf32, #tpu.memory_space<vmem>>, vector<1x8x16xf32>
    %11 = vector.shape_cast %10 : vector<1x8x16xf32> to vector<8x16xf32>
    %c1_10 = arith.constant 1 : index
    %c0_11 = arith.constant 0 : index
    %c0_12 = arith.constant 0 : index
    %12 = vector.load %arg3[%c1_10, %c0_11, %c0_12] : memref<3x16x1xf32, #tpu.memory_space<vmem>>, vector<1x8x1xf32>
    %13 = vector.shape_cast %12 : vector<1x8x1xf32> to vector<8x1xf32>
    %cst_13 = arith.constant dense<0.000000e+00> : vector<8x256xf32>
    %14 = tpu.matmul %11, %9, %cst_13 {dimension_numbers = #tpu.dot_dimension_numbers<[1], [0], [0], [1], [0, 0, 1, 1], [], []>} : vector<8x16xf32>, vector<16x256xf32>, vector<8x256xf32> -> vector<8x256xf32>
    %15 = vector.broadcast %13 : vector<8x1xf32> to vector<8x256xf32>
    %16 = arith.addf %14, %15 : vector<8x256xf32>
    %cst_14 = arith.constant 0.000000e+00 : f32
    %17 = vector.broadcast %cst_14 : f32 to vector<8x256xf32>
    %18 = arith.maximumf %16, %17 : vector<8x256xf32>
    %c2 = arith.constant 2 : index
    %c0_15 = arith.constant 0 : index
    %c0_16 = arith.constant 0 : index
    %19 = vector.load %arg2[%c2, %c0_15, %c0_16] : memref<3x16x16xf32, #tpu.memory_space<vmem>>, vector<1x8x1xf32>
    %20 = vector.shape_cast %19 : vector<1x8x1xf32> to vector<8x1xf32>
    %c2_17 = arith.constant 2 : index
    %c0_18 = arith.constant 0 : index
    %c0_19 = arith.constant 0 : index
    %21 = vector.load %arg3[%c2_17, %c0_18, %c0_19] : memref<3x16x1xf32, #tpu.memory_space<vmem>>, vector<1x1x1xf32>
    %22 = vector.shape_cast %21 : vector<1x1x1xf32> to vector<1x1xf32>
    %23 = vector.broadcast %20 : vector<8x1xf32> to vector<8x256xf32>
    %24 = arith.mulf %18, %23 : vector<8x256xf32>
    %cst_20 = arith.constant dense<0.000000e+00> : vector<256xf32>
    %25 = vector.multi_reduction <add>, %24, %cst_20 [0] : vector<8x256xf32> to vector<256xf32>
    %26 = vector.shape_cast %25 : vector<256xf32> to vector<1x256xf32>
    %27 = vector.broadcast %22 : vector<1x1xf32> to vector<1x256xf32>
    %28 = arith.addf %26, %27 : vector<1x256xf32>
    %c0_21 = arith.constant 0 : index
    %c0_22 = arith.constant 0 : index
    %29 = vector.load %arg4[%c0_21, %c0_22] : memref<1x256xf32, #tpu.memory_space<vmem>>, vector<1x256xf32>
    tpu.vector_store %arg4[%c0_21, %c0_22], %28 {strides = array<i32>} : memref<1x256xf32, #tpu.memory_space<vmem>>, vector<1x256xf32>,
    return
  }
  func.func @transform_0(%arg0: i32) -> (i32, i32) {
    %c0_i32 = arith.constant 0 : i32
    %c0_i32_0 = arith.constant 0 : i32
    return %arg0, %c0_i32 : i32, i32
  }
  func.func @transform_1(%arg0: i32) -> (i32, i32, i32) {
    %c0_i32 = arith.constant 0 : i32
    %c0_i32_0 = arith.constant 0 : i32
    %c0_i32_1 = arith.constant 0 : i32
    %c0_i32_2 = arith.constant 0 : i32
    return %c0_i32, %c0_i32_0, %c0_i32_1 : i32, i32, i32
  }
  func.func @transform_2(%arg0: i32) -> (i32, i32, i32) {
    %c0_i32 = arith.constant 0 : i32
    %c0_i32_0 = arith.constant 0 : i32
    %c0_i32_1 = arith.constant 0 : i32
    %c0_i32_2 = arith.constant 0 : i32
    return %c0_i32, %c0_i32_0, %c0_i32_1 : i32, i32, i32
  }
  func.func @transform_3(%arg0: i32) -> (i32, i32) {
    %c0_i32 = arith.constant 0 : i32
    %c0_i32_0 = arith.constant 0 : i32
    return %c0_i32, %arg0 : i32, i32
  }
}

module attributes {stable_mosaic.version = 11 : i64} {
  func.func @mlp_kernel(%arg0: i32, %arg1: memref<6x256xf32, #tpu.memory_space<vmem>>, %arg2: memref<3x16x16xf32, #tpu.memory_space<vmem>>, %arg3: memref<3x16x1xf32, #tpu.memory_space<vmem>>, %arg4: memref<1x256xf32, #tpu.memory_space<vmem>>) attributes {dimension_semantics = [#tpu.dimension_semantics<parallel>], iteration_bounds = array<i64: 8>, scalar_prefetch = 0 : i64, scratch_operands = 0 : i64, tpu.core_type = #tpu.core_type<tc>, window_params = [{transform_indices = @transform_0, window_bounds = array<i64: 6, 256>}, {pipeline_mode = #tpu.pipeline_mode<synchronous>, transform_indices = @transform_1, window_bounds = array<i64: 3, 16, 16>}, {pipeline_mode = #tpu.pipeline_mode<synchronous>, transform_indices = @transform_2, window_bounds = array<i64: 3, 16, 1>}, {transform_indices = @transform_3, window_bounds = array<i64: 1, 256>}]} {
    %c0 = arith.constant 0 : index
    %c0_0 = arith.constant 0 : index
    %c0_1 = arith.constant 0 : index
    %0 = vector.load %arg2[%c0, %c0_0, %c0_1] : memref<3x16x16xf32, #tpu.memory_space<vmem>>, vector<1x16x6xf32>
    %1 = vector.shape_cast %0 : vector<1x16x6xf32> to vector<16x6xf32>
    %c0_2 = arith.constant 0 : index
    %c0_3 = arith.constant 0 : index
    %c0_4 = arith.constant 0 : index
    %2 = vector.load %arg3[%c0_2, %c0_3, %c0_4] : memref<3x16x1xf32, #tpu.memory_space<vmem>>, vector<1x16x1xf32>
    %3 = vector.shape_cast %2 : vector<1x16x1xf32> to vector<16x1xf32>
    %c0_5 = arith.constant 0 : index
    %c0_6 = arith.constant 0 : index
    %4 = vector.load %arg1[%c0_5, %c0_6] : memref<6x256xf32, #tpu.memory_space<vmem>>, vector<6x256xf32>
    %cst = arith.constant dense<0.000000e+00> : vector<16x256xf32>
    %5 = tpu.matmul %1, %4, %cst {dimension_numbers = #tpu.dot_dimension_numbers<[1], [0], [0], [1], [0, 0, 1, 1], [], []>} : vector<16x6xf32>, vector<6x256xf32>, vector<16x256xf32> -> vector<16x256xf32>
    %6 = vector.broadcast %3 : vector<16x1xf32> to vector<16x256xf32>
    %7 = arith.addf %5, %6 : vector<16x256xf32>
    %cst_7 = arith.constant 0.000000e+00 : f32
    %8 = vector.broadcast %cst_7 : f32 to vector<16x256xf32>
    %9 = arith.maximumf %7, %8 : vector<16x256xf32>
    %c1 = arith.constant 1 : index
    %c0_8 = arith.constant 0 : index
    %c0_9 = arith.constant 0 : index
    %10 = vector.load %arg2[%c1, %c0_8, %c0_9] : memref<3x16x16xf32, #tpu.memory_space<vmem>>, vector<1x8x16xf32>
    %11 = vector.shape_cast %10 : vector<1x8x16xf32> to vector<8x16xf32>
    %c1_10 = arith.constant 1 : index
    %c0_11 = arith.constant 0 : index
    %c0_12 = arith.constant 0 : index
    %12 = vector.load %arg3[%c1_10, %c0_11, %c0_12] : memref<3x16x1xf32, #tpu.memory_space<vmem>>, vector<1x8x1xf32>
    %13 = vector.shape_cast %12 : vector<1x8x1xf32> to vector<8x1xf32>
    %cst_13 = arith.constant dense<0.000000e+00> : vector<8x256xf32>
    %14 = tpu.matmul %11, %9, %cst_13 {dimension_numbers = #tpu.dot_dimension_numbers<[1], [0], [0], [1], [0, 0, 1, 1], [], []>} : vector<8x16xf32>, vector<16x256xf32>, vector<8x256xf32> -> vector<8x256xf32>
    %15 = vector.broadcast %13 : vector<8x1xf32> to vector<8x256xf32>
    %16 = arith.addf %14, %15 : vector<8x256xf32>
    %cst_14 = arith.constant 0.000000e+00 : f32
    %17 = vector.broadcast %cst_14 : f32 to vector<8x256xf32>
    %18 = arith.maximumf %16, %17 : vector<8x256xf32>
    %c2 = arith.constant 2 : index
    %c0_15 = arith.constant 0 : index
    %c0_16 = arith.constant 0 : index
    %19 = vector.load %arg2[%c2, %c0_15, %c0_16] : memref<3x16x16xf32, #tpu.memory_space<vmem>>, vector<1x8x1xf32>
    %20 = vector.shape_cast %19 : vector<1x8x1xf32> to vector<8x1xf32>
    %c2_17 = arith.constant 2 : index
    %c0_18 = arith.constant 0 : index
    %c0_19 = arith.constant 0 : index
    %21 = vector.load %arg3[%c2_17, %c0_18, %c0_19] : memref<3x16x1xf32, #tpu.memory_space<vmem>>, vector<1x1x1xf32>
    %22 = vector.shape_cast %21 : vector<1x1x1xf32> to vector<1x1xf32>
    %23 = vector.broadcast %20 : vector<8x1xf32> to vector<8x256xf32>
    %24 = arith.mulf %18, %23 : vector<8x256xf32>
    %cst_20 = arith.constant dense<0.000000e+00> : vector<256xf32>
    %25 = vector.multi_reduction <add>, %24, %cst_20 [0] : vector<8x256xf32> to vector<256xf32>
    %26 = vector.shape_cast %25 : vector<256xf32> to vector<1x256xf32>
    %27 = vector.broadcast %22 : vector<1x1xf32> to vector<1x256xf32>
    %28 = arith.addf %26, %27 : vector<1x256xf32>
    %c0_21 = arith.constant 0 : index
    %c0_22 = arith.constant 0 : index
    %29 = vector.load %arg4[%c0_21, %c0_22] : memref<1x256xf32, #tpu.memory_space<vmem>>, vector<1x256xf32>
    tpu.vector_store %arg4[%c0_21, %c0_22], %28 {strides = array<i32>} : memref<1x256xf32, #tpu.memory_space<vmem>>, vector<1x256xf32>,
    return
  }
  func.func @transform_0(%arg0: i32) -> (i32, i32) {
    %c0_i32 = arith.constant 0 : i32
    %c0_i32_0 = arith.constant 0 : i32
    return %c0_i32, %arg0 : i32, i32
  }
  func.func @transform_1(%arg0: i32) -> (i32, i32, i32) {
    %c0_i32 = arith.constant 0 : i32
    %c0_i32_0 = arith.constant 0 : i32
    %c0_i32_1 = arith.constant 0 : i32
    %c0_i32_2 = arith.constant 0 : i32
    return %c0_i32, %c0_i32_0, %c0_i32_1 : i32, i32, i32
  }
  func.func @transform_2(%arg0: i32) -> (i32, i32, i32) {
    %c0_i32 = arith.constant 0 : i32
    %c0_i32_0 = arith.constant 0 : i32
    %c0_i32_1 = arith.constant 0 : i32
    %c0_i32_2 = arith.constant 0 : i32
    return %c0_i32, %c0_i32_0, %c0_i32_1 : i32, i32, i32
  }
  func.func @transform_3(%arg0: i32) -> (i32, i32) {
    %c0_i32 = arith.constant 0 : i32
    %c0_i32_0 = arith.constant 0 : i32
    return %c0_i32, %arg0 : i32, i32
  }
}

</mosaic_0001>

<bundles_post_ra>
// kernel: tpu_custom_call.1
= control target key start
LH: loop header
LB: loop body
LE: loop exit
PB: predicated region body
PF: predicated region fallthrough
CT: control target
= control target key end

     0   :  { %8 = vsyncpa [#allocation3], 0  ;;  %s1110_s0 = inlined_call_operand.vmem [shape: f32[2000,6], index: 0, kind: input, shape index: {}]   ;;  %s1111_s1 = inlined_call_operand.vmem [shape: f32[3,16,16], index: 1, kind: input, shape index: {}]   ;;  %s1112_s2 = inlined_call_operand.vmem [shape: f32[3,16,1], index: 2, kind: input, shape index: {}]   ;;  %s1113_s3 = inlined_call_operand.hbm [shape: f32[1,2000], index: 3, kind: output, shape index: {}]  }
   0x1   :  { %10 = vsyncpa [#allocation3 + $0x1], 0  ;;  %s907_s12 = smov 0   ;;  %s909_s13 = smov 0  }
   0x2   :  { %s911_s14 = smov 0   ;;  %s913_s15 = smov 0  }
   0x3 LB: > { %s634_s16 = sadd.s32 4294967295, %s881_s15   ;;  %s635_s17 = sadd.s32 4294967294, %s881_s15   ;;  %s881_s15 = sphi %s913_s15, %s1121_s15   ;;  %s877_s14 = sphi %s911_s14, %s1120_s14   ;;  %s873_s13 = sphi %s909_s13, %s1119_s13   ;;  %s869_s12 = sphi %s907_s12, %s1118_s12  }
   0x4   : > { %s930_s18 = sadd.s32 1, %s881_s15   ;;  %s91_s19 = sadd.s32 1, %s877_s14 }
   0x5   : > { %s88_s20 = ssub.s32 %s881_s15, %s930_s18  ;;  %p101_p0 = scmp.ne.s32.totalorder %s877_s14, %s873_s13 }
   0x6   : > { %p89_p1 = scmp.eq.s32.totalorder %s88_s20, 0  ;;  %p102_p2 = scmp.eq.s32.totalorder %s634_s16, 7 }
   0x7   : > { %p107_p3 = scmp.ne.s32.totalorder %s873_s13, %s869_s12  ;;  %p108_p4 = scmp.eq.s32.totalorder %s635_s17, 7 }
   0x8   : > { %s940_s21 = scalar_select %p89_p1, %s877_s14, %s91_s19  }
   0x9   : > { %p942_p5 = por %p102_p2, %p101_p0  ;;  %p946_p6 = por %p108_p4, %p107_p3 }
   0xa   : > { %p638_p7 = scmp.ge.s32.totalorder %s881_s15, 1  ;;  %p149_p8 = scmp.lt.s32.totalorder %s881_s15, 9 }
   0xc   : > { %p150_p9 = pnand %p638_p7, %p149_p8 }
   0xd   : > { %s952_s24 = sshll.u32 (!%p150_p9), %s634_s16, 5  ;;  %vm238_vm0 = vcmask (!%p150_p9), 48128   ;;  %v957_v0 = vld [vmem:[%s1111_s1] sm:$0xff] (!%p150_p9)  ;;  %v883_v2 = vmov (!%p150_p9), 0   ;;  %v195_v3 = vld [vmem:[%s1112_s2 + $0x8] sm:$0xff] (!%p150_p9)  ;;  %v884_v55 = vmov (!%p150_p9), 0.0  }
   0xe   : > { %153 = sbr.rel (%p150_p9) target bundleno = 572 (0x23c), region = 32  ;;  %v194_v1 = vld [vmem:[%s1112_s2] sm:$0xff] (!%p150_p9)  ;;  %p182_p10 = scmp.lt.s32.totalorder (!%p150_p9), %s952_s24, 249  ;;  %719 = vmatprep.mubr.msk.f32.mxu0 (!%p150_p9), %vm238_vm0, %v957_v0  ;;  %817 = vset.pattern.permute.xlu0 (!%p150_p9), %v883_v2  ;;  %vm976_vm1 = vmpackc.low (!%p150_p9), %vm238_vm0, %vm238_vm0  ;;  %v193_v54 = vld [vmem:[%s1111_s1 + $0x8] sm:$0xff] (!%p150_p9)  ;;  %vm431_vm2 = vcmask (!%p150_p9), 130048  }
   0xf   : > { %230 = vperm.xlu0 (!%p150_p9), %817, %v194_v1   ;;  %818 = vset.pattern.permute.xlu1 (!%p150_p9), %v883_v2  ;;  %v680_v5 = vld [vmem:[%s1112_s2 + $0x20] sm:$0x1] (!%p150_p9)  ;;  %v677_v56 = vld [vmem:[%s1112_s2 + $0x10] sm:$0xff] (!%p150_p9)  ;;  %s174_s28 = sand.u32 (!%p150_p9), 1, %s873_s13   ;;  %s1068_s7 = scalar_lea.hbm (!%p150_p9), %s1113_s3, %s952_s24 }
  0x10   : > { %499 = vmatprep.mubr.f32.mxu1 (!%p150_p9), %v884_v55  ;;  %428 = vperm.xlu1 (!%p150_p9), %818, %v677_v56   ;;  %v679_v57 = vld [vmem:[%s1111_s1 + $0x20] sm:$0xff] (!%p150_p9)  ;;  %s886_s10 = smov (!%p150_p9), [#allocation2]  }
  0x11   : > { %s823_s11 = sshll.u32 (!%p150_p9), %s886_s10, 4  ;;  %s824_s11 = int_to_ptr.vmem [resolvable:$false] %s823_s11 }
  0x12   : > { %s825_s16 = scalar_lea.vmem (!%p150_p9), %s824_s11, 64 }
  0x13   : > { %235 = vperm.xlu0 (!%p150_p9), %817, %v195_v3  }
  0x14   : > { %514 = vperm.xlu1 (!%p150_p9), %818, %v679_v57  }
  0x15   : > { %s183_s29 = scalar_select %p182_p10, %s952_s24, 249 }
  0x17   : > { %s641_s5 = sshll.u32 %s183_s29, 3  ;;  %533 = vperm.xlu0 %817, %v680_v5   ;;  %s639_s29 = sshll.u32 %s174_s28, 1 }
  0x18   : > { %s972_s8 = scalar_lea.vmem %s1110_s0, %s641_s5  ;;  %s176_s30 = scalar_lea.vmem [#allocation2], %s639_s29 }
  0x19   : > { %v212_v6 = vld [vmem:[%s972_s8 + $0x80] sm:$0xff]  ;;  %v213_v7 = vld [vmem:[%s972_s8 + $0x88] sm:$0xff]  ;;  %v214_v11 = vld [vmem:[%s972_s8 + $0x90] sm:$0xff]  ;;  %s576_s4 = sshll.u32 %s176_s30, 4  ;;  %s1070_s4 = int_to_ptr.vmem [resolvable:$true] %s576_s4 }
  0x1a   : > { %v196_v8 = vld [vmem:[%s972_s8] sm:$0xff]  ;;  %v723_v9 = vpack.c.bf16 %v213_v7, %v212_v6  ;;  %v197_v10 = vld [vmem:[%s972_s8 + $0x8] sm:$0xff]  ;;  %v215_v12 = vld [vmem:[%s972_s8 + $0x98] sm:$0xff]  ;;  %s819_s9 = scalar_lea.vmem %s1070_s4, 32  ;;  %p826_p0 = scmp.lt.s32.totalorder %s1070_s4, %s824_s11 }
  0x1b   : > { %v726_v13 = vpack.c.bf16 %v197_v10, %v196_v8  ;;  %v729_v14 = vpack.c.bf16 %v215_v12, %v214_v11  ;;  %v198_v15 = vld [vmem:[%s972_s8 + $0x10] sm:$0xff]  ;;  %v199_v16 = vld [vmem:[%s972_s8 + $0x18] sm:$0xff]  ;;  %v216_v17 = vld [vmem:[%s972_s8 + $0xa0] sm:$0xff]  ;;  %p820_p11 = scmp.ne.s32.totalorder %s1070_s4, %s819_s9  ;;  %p827_p1 = scmp.lt.s32.totalorder %s825_s16, %s819_s9 }
  0x1c   : > { %725 = vmatprep.subr.msk.bf16.mxu0 %vm976_vm1, %v723_v9  ;;  %v217_v18 = vld [vmem:[%s972_s8 + $0xa8] sm:$0xff]  ;;  %v732_v19 = vpack.c.bf16 %v199_v16, %v198_v15  ;;  %v200_v21 = vld [vmem:[%s972_s8 + $0x20] sm:$0xff]  ;;  %v218_v23 = vld [vmem:[%s972_s8 + $0xb0] sm:$0xff] }
  0x1d   : > { %728 = vmatpush3.bf16.xpose.msk.msra.mxu0 %vm976_vm1, %v726_v13  ;;  %v735_v20 = vpack.c.bf16 %v217_v18, %v216_v17  ;;  %v201_v22 = vld [vmem:[%s972_s8 + $0x28] sm:$0xff]  ;;  %v219_v24 = vld [vmem:[%s972_s8 + $0xb8] sm:$0xff]  ;;  %v202_v27 = vld [vmem:[%s972_s8 + $0x30] sm:$0xff]  ;;  %p821_p12 = pnand %p820_p11, %p942_p5  ;;  %p828_p2 = por %p827_p1, %p826_p0 }
  0x1e   : > { %731 = vmatprep.subr.msk.bf16.mxu0 %vm976_vm1, %v729_v14  ;;  %v738_v25 = vpack.c.bf16 %v201_v22, %v200_v21  ;;  %v741_v26 = vpack.c.bf16 %v219_v24, %v218_v23  ;;  %v203_v28 = vld [vmem:[%s972_s8 + $0x38] sm:$0xff]  ;;  %v220_v29 = vld [vmem:[%s972_s8 + $0xc0] sm:$0xff]  ;;  %v221_v30 = vld [vmem:[%s972_s8 + $0xc8] sm:$0xff] }
  0x1f   : > { %v744_v31 = vpack.c.bf16 %v203_v28, %v202_v27  ;;  %v747_v32 = vpack.c.bf16 %v221_v30, %v220_v29  ;;  %v204_v33 = vld [vmem:[%s972_s8 + $0x40] sm:$0xff]  ;;  %v205_v34 = vld [vmem:[%s972_s8 + $0x48] sm:$0xff]  ;;  %v222_v35 = vld [vmem:[%s972_s8 + $0xd0] sm:$0xff]  ;;  %v885_v27 = vmov 1966171168   ;;  %v544_v29 = vlaneseq  ;;  %p822_p13 = pneg %p821_p12 }
  0x20   : > { %v223_v36 = vld [vmem:[%s972_s8 + $0xd8] sm:$0xff]  ;;  %v750_v37 = vpack.c.bf16 %v205_v34, %v204_v33  ;;  %v206_v39 = vld [vmem:[%s972_s8 + $0x50] sm:$0xff]  ;;  %v224_v41 = vld [vmem:[%s972_s8 + $0xe0] sm:$0xff]  ;;  %v542_v28 = vunpack.c.l.s4 %v885_v27 }
  0x21   : > { %v753_v38 = vpack.c.bf16 %v223_v36, %v222_v35  ;;  %v207_v40 = vld [vmem:[%s972_s8 + $0x58] sm:$0xff]  ;;  %v225_v42 = vld [vmem:[%s972_s8 + $0xe8] sm:$0xff]  ;;  %v208_v45 = vld [vmem:[%s972_s8 + $0x60] sm:$0xff]  ;;  %v545_v35 = vshrl.u32 %v544_v29, 7  ;;  %vm558_vm3 = vcmp.lt.s32.totalorder %v544_v29, 256  ;;  %p829_p3 = pnand %p828_p2, %p822_p13 }
  0x22   : > { %v756_v43 = vpack.c.bf16 %v207_v40, %v206_v39  ;;  %v759_v44 = vpack.c.bf16 %v225_v42, %v224_v41  ;;  %v209_v46 = vld [vmem:[%s972_s8 + $0x68] sm:$0xff]  ;;  %v226_v47 = vld [vmem:[%s972_s8 + $0xf0] sm:$0xff]  ;;  %v227_v48 = vld [vmem:[%s972_s8 + $0xf8] sm:$0xff]  ;;  %v543_v34 = vunpack.c.0.s8 %v542_v28 }
  0x23   : > { %v762_v49 = vpack.c.bf16 %v209_v46, %v208_v45  ;;  %v765_v50 = vpack.c.bf16 %v227_v48, %v226_v47  ;;  %v210_v51 = vld [vmem:[%s972_s8 + $0x70] sm:$0xff]  ;;  %v211_v52 = vld [vmem:[%s972_s8 + $0x78] sm:$0xff]  ;;  %s562_s8 = scalar_lea.sflag [#allocation3], %s174_s28 }
  0x24   : > { %v768_v53 = vpack.c.bf16 %v211_v52, %v210_v51  ;;  %v676_v10 = vld [vmem:[%s1111_s1 + $0x10] sm:$0xff]  ;;  %v546_v41 = vsub.s32 %v543_v34, %v545_v35 }
  0x25   : > { %734 = vmatpush3.bf16.xpose.msk.msra.mxu0 %vm976_vm1, %v732_v19 }
  0x26   : > { %737 = vmatprep.subr.msk.bf16.mxu0 %vm976_vm1, %v735_v20 }
  0x2d   : > { %740 = vmatpush3.bf16.xpose.msk.msra.mxu0 %vm976_vm1, %v738_v25 }
  0x2e   : > { %743 = vmatprep.subr.msk.bf16.mxu0 %vm976_vm1, %v741_v26 }
  0x35   : > { %746 = vmatpush3.bf16.xpose.msk.msra.mxu0 %vm976_vm1, %v744_v31 }
  0x36   : > { %749 = vmatprep.subr.msk.bf16.mxu0 %vm976_vm1, %v747_v32 }
  0x3d   : > { %752 = vmatpush3.bf16.xpose.msk.msra.mxu0 %vm976_vm1, %v750_v37 }
  0x3e   : > { %755 = vmatprep.subr.msk.bf16.mxu0 %vm976_vm1, %v753_v38 }
  0x45   : > { %758 = vmatpush3.bf16.xpose.msk.msra.mxu0 %vm976_vm1, %v756_v43 }
  0x46   : > { %761 = vmatprep.subr.msk.bf16.mxu0 %vm976_vm1, %v759_v44 }
  0x4d   : > { %764 = vmatpush3.bf16.xpose.msk.msra.mxu0 %vm976_vm1, %v762_v49 }
  0x4e   : > { %767 = vmatprep.subr.msk.bf16.mxu0 %vm976_vm1, %v765_v50 }
  0x55   : > { %770 = vmatpush3.bf16.xpose.msk.msra.mxu0 %vm976_vm1, %v768_v53 }
  0x5c   : > { %720 = vmatmul.mubr.msk.f32.vlgmr.msra.gmra.mrb[0].mxu0 %vm238_vm0, %v957_v0 }
  0x5d   : > { %721 = vmatprep.mubr.msk.f32.mxu0 %vm238_vm0, %v193_v54 }
  0x60   : > { %722 = vmatmul.mubr.msk.f32.gmra.mrb[2].mxu0 %vm238_vm0, %v193_v54 }
  0x8e   : > { %v231_v58 = vpop.permute.xlu0 %230 }
  0x8f   : > { %v429_v11 = vpop.permute.xlu1 %428 }
  0x92   : > { %v236_v62 = vpop.permute.xlu0 %235 }
  0x93   : > { %v515_v17 = vpop.permute.xlu1 %514 }
  0x96   : > { %v534_v37 = vpop.permute.xlu0 %533 }
 0x12f   : > { %v407_v59 = vpop.f32.mrb[0].mxu0 }
 0x130   : > { %v409_v60 = vpop.f32.mrb[1].mxu0  ;;  %v408_v61 = vadd.f32 %v407_v59, %v231_v58 }
 0x131   : > { %v410_v63 = vadd.f32 %v409_v60, %v231_v58 }
 0x132   : > { %v418_v4 = vmax.f32 %v408_v61, 0.0 }
 0x133   : > { %v413_v0 = vpop.f32.mrb[2].mxu0  ;;  %v419_v6 = vmax.f32 %v410_v63, 0.0 }
 0x134   : > { %v414_v1 = vadd.f32 %v413_v0, %v236_v62  ;;  %v415_v2 = vpop.f32.mrb[3].mxu0 }
 0x135   : > { %v416_v3 = vadd.f32 %v415_v2, %v236_v62 }
 0x136   : > { %v420_v5 = vmax.f32 %v414_v1, 0.0 }
 0x137   : > { %v421_v7 = vmax.f32 %v416_v3, 0.0 }
 0x138   : > { %v773_v8 = vpack.c.bf16 %v420_v5, %v418_v4 }
 0x139   : > { %v771_v9 = vpack.c.bf16 %v421_v7, %v419_v6 }
 0x13b   : > { %772 = vmatprep.subr.bf16.mxu1 %v771_v9 }
 0x13c   : > { %774 = vmatpush1.bf16.msra.mxu1 %v773_v8 }
 0x13f   : > { %678 = vmatmul.mubr.msk.f32.vlgmr.msra.gmra.mrb[0].mxu1 %vm431_vm2, %v676_v10 }
 0x212   : > { %v501_v12 = vpop.f32.mrb[0].mxu1 }
 0x213   : > { %v502_v13 = vadd.f32 %v501_v12, %v429_v11  ;;  %v503_v14 = vpop.f32.mrb[1].mxu1 }
 0x214   : > { %v504_v15 = vadd.f32 %v503_v14, %v429_v11 }
 0x215   : > { %v506_v16 = vmax.f32 %v502_v13, 0.0 }
 0x216   : > { %v507_v18 = vmax.f32 %v504_v15, 0.0 }
 0x217   : > { %v517_v19 = vmul.f32 %v515_v17, %v506_v16 }
 0x218   : > { %v518_v20 = vmul.f32 %v515_v17, %v507_v18 }
 0x219   : > { %v519_v21 = vrot.slane %v517_v19, 4 }
 0x21a   : > { %v525_v22 = vrot.slane %v518_v20, 4 }
 0x21b   : > { %v520_v23 = vadd.f32 %v519_v21, %v517_v19 }
 0x21c   : > { %v526_v24 = vadd.f32 %v525_v22, %v518_v20 }
 0x21d   : > { %v521_v25 = vrot.slane %v520_v23, 2 }
 0x21e   : > { %v527_v26 = vrot.slane %v526_v24, 2 }
 0x21f   : > { %v522_v30 = vadd.f32 %v521_v25, %v520_v23 }
 0x220   : > { %v528_v31 = vadd.f32 %v527_v26, %v526_v24 }
 0x221   : > { %v523_v32 = vrot.slane %v522_v30, 1 }
 0x222   : > { %v529_v33 = vrot.slane %v528_v31, 1 }
 0x223   : > { %v524_v36 = vadd.f32 %v523_v32, %v522_v30 }
 0x224   : > { %v530_v38 = vadd.f32 %v529_v33, %v528_v31 }
 0x225   : > { %v536_v39 = vadd.f32 %v534_v37, %v524_v36 }
 0x226   : > { %v537_v40 = vadd.f32 %v534_v37, %v530_v38 }
 0x228   : > { %v540_v42 = vcombine.low %v536_v39, %v537_v40 }
 0x22a   : > { %v547_v43 = vrot.slane %v540_v42, %v546_v41 }
 0x22c   : > { %v554_v44 = vrot.slane %v547_v43, %v546_v41 }
 0x22e   : > { %560 = vst.msk [vmem:[%s176_s30] sm:$0x3] %vm558_vm3, %v554_v44 }
 0x22f   : > { %832 = shalt.err (!%p829_p3)
}
 0x230   : > { %s833_s24 = scalar_lea.hbm %s1068_s7, 32  ;;  %s837_s20 = scalar_lea.hbm %s1113_s3, 256 }
 0x231   : > { %p834_p4 = scmp.ne.s32.totalorder %s1068_s7, %s833_s24  ;;  %p838_p9 = scmp.lt.u32.totalorder %s1068_s7, %s1113_s3 }
 0x232   : > { %p839_p10 = scmp.lt.u32.totalorder %s837_s20, %s833_s24  ;;  %p841_p12 = scmp.lt.u32.totalorder %s833_s24, %s1068_s7 }
 0x233   : > { %p835_p7 = pnand %p834_p4, %p942_p5 }
 0x234   : > { %p840_p11 = por %p839_p10, %p838_p9 }
 0x235   : > { %p836_p8 = pneg %p835_p7 }
 0x236   : > { %p842_p13 = por %p841_p12, %p840_p11 }
 0x238   : > { %p843_p0 = pnand %p842_p13, %p836_p8 }
 0x23a   : > { %846 = shalt.err (!%p843_p0)
}
 0x23b   : > { %775 = dma.vmem_to_hbm [thread:$0]  (%p942_p5), %s1070_s4, 32, %s1068_s7, %s562_s8  }
 0x23c PF: > { %p781_p1 = scmp.ge.s32.totalorder %s881_s15, 2  ;;  %s588_s27 = sand.u32 1, %s869_s12  }
 0x23d   : > { %s589_s28 = scalar_lea.sflag [#allocation3], %s588_s27 }
 0x23e   : > { %p778_p2 = pnand %p781_p1, %p946_p6 }
 0x240   : > { %864 = dma.done.wait (!%p778_p2), %s589_s28, 32  }
 0x241   : > { %866 = vsyncadd (!%p778_p2), %s589_s28, 4294967264  ;;  %p13_p3 = scmp.ge.s32.totalorder %s930_s18, 10   ;;  %s1118_s12 = smov %s873_s13 }
 0x242   : > { %s1119_s13 = smov %s877_s14  ;;  %s1120_s14 = smov %s940_s21 }
 0x243   : > { %s1121_s15 = smov %s930_s18  ;;  %15 = sbr.rel (!%p13_p3) target bundleno = 3 (0x3), region = 71 }
 0x24a   :  { %594 = vsyncpa [#allocation3], 1 }
 0x24b   :  { %596 = vsyncpa [#allocation3 + $0x1], 1 }

// kernel: tpu_custom_call.1
= control target key start
LH: loop header
LB: loop body
LE: loop exit
PB: predicated region body
PF: predicated region fallthrough
CT: control target
= control target key end

     0   :  { %8 = vsyncpa [#allocation3], 0  ;;  %s911_s0 = inlined_call_operand.hbm [shape: f32[6,2000], index: 0, kind: input, shape index: {}]   ;;  %s912_s1 = inlined_call_operand.vmem [shape: f32[3,16,16], index: 1, kind: input, shape index: {}]   ;;  %s913_s2 = inlined_call_operand.vmem [shape: f32[3,16,1], index: 2, kind: input, shape index: {}]   ;;  %s914_s3 = inlined_call_operand.hbm [shape: f32[1,2000], index: 3, kind: output, shape index: {}]  }
   0x1   :  { %10 = vsyncpa [#allocation3 + $0x1], 0 }
   0x2   :  { %11 = vsyncpa [#allocation4], 0 }
   0x3   :  { %13 = vsyncpa [#allocation4 + $0x1], 0  ;;  %s727_s12 = smov 0   ;;  %s729_s13 = smov 0  }
   0x4   :  { %s731_s14 = smov 0   ;;  %s733_s15 = smov 0  }
   0x5 LB: > { %s748_s16 = sadd.s32 4294967295, %s700_s15   ;;  %s524_s17 = sadd.s32 4294967294, %s700_s15   ;;  %s700_s15 = sphi %s733_s15, %s928_s15   ;;  %s696_s14 = sphi %s731_s14, %s927_s14   ;;  %s692_s13 = sphi %s729_s13, %s926_s13   ;;  %s688_s12 = sphi %s727_s12, %s925_s12  }
   0x6   : > { %s752_s18 = sadd.s32 1, %s700_s15   ;;  %s26_s19 = sadd.s32 1, %s696_s14 }
   0x7   : > { %s23_s20 = ssub.s32 %s700_s15, %s752_s18  ;;  %p33_p0 = scmp.ne.s32.totalorder %s696_s14, %s692_s13 }
   0x8   : > { %p24_p1 = scmp.eq.s32.totalorder %s23_s20, 0  ;;  %p34_p2 = scmp.eq.s32.totalorder %s700_s15, 0 }
   0x9   : > { %p39_p3 = scmp.ne.s32.totalorder %s692_s13, %s688_s12  ;;  %p40_p4 = scmp.eq.s32.totalorder %s748_s16, 0 }
   0xa   : > { %s764_s21 = scalar_select %p24_p1, %s696_s14, %s26_s19  }
   0xb   : > { %p766_p5 = por %p34_p2, %p33_p0  ;;  %p770_p6 = por %p40_p4, %p39_p3 }
   0xc   : > { %p105_p7 = scmp.eq.s32.totalorder %s748_s16, 7  ;;  %p111_p8 = scmp.eq.s32.totalorder %s524_s17, 7 }
   0xd   : > { %p565_p9 = scmp.lt.s32.totalorder %s700_s15, 8  ;;  %s137_s26 = sand.u32 1, %s696_s14  }
   0xe   : > { %p776_p10 = por %p105_p7, %p33_p0  ;;  %p780_p11 = por %p111_p8, %p39_p3 }
   0xf   : > { %s547_s27 = sshll.u32 %s700_s15, 8  ;;  %s527_s28 = sshll.u32 %s137_s26, 4 }
  0x10   : > { %s918_s24 = scalar_select %p776_p10, 1, 0 }
  0x11   : > { %s919_s25 = scalar_select %p780_p11, 1, 0 }
  0x12   : > { %s789_s4 = scalar_lea.hbm %s911_s0, %s547_s27  ;;  %s141_s5 = scalar_lea.vmem [#allocation2], %s527_s28 }
  0x13   : > { %s149_s6 = sshll.u32 %s141_s5, 4  ;;  %p793_p12 = pnand %p565_p9, %p766_p5  ;;  %s797_s6 = int_to_ptr.vmem [resolvable:$true] %s149_s6 }
  0x14   : > { %s138_s8 = scalar_lea.sflag [#allocation3], %s137_s26  ;;  %s604_s9 = scalar_lea.hbm %s789_s4, 256 }
  0x15   : > { %p605_p1 = scmp.ne.s32.totalorder %s789_s4, %s604_s9  ;;  %p606_p2 = pneg %p793_p12 }
  0x16   : > { %s609_s17 = scalar_lea.hbm %s911_s0, 2048  ;;  %p610_p5 = scmp.lt.u32.totalorder %s789_s4, %s911_s0 }
  0x17   : > { %p607_p3 = pnand %p606_p2, %p605_p1  ;;  %p611_p7 = scmp.lt.u32.totalorder %s609_s17, %s604_s9 }
  0x18   : > { %p613_p9 = scmp.lt.u32.totalorder %s604_s9, %s789_s4 }
  0x19   : > { %p608_p4 = pneg %p607_p3  ;;  %p612_p8 = por %p611_p7, %p610_p5 }
  0x1b   : > { %p614_p13 = por %p613_p9, %p612_p8 }
  0x1d   : > { %p615_p0 = pnand %p614_p13, %p608_p4 }
  0x1f   : > { %618 = shalt.err (!%p615_p0)
}
  0x20   : > { %s619_s22 = scalar_lea.vmem %s797_s6, 256  ;;  %s702_s26 = smov [#allocation2]  }
  0x21   : > { %p620_p1 = scmp.ne.s32.totalorder %s797_s6, %s619_s22  ;;  %s624_s27 = sshll.u32 %s702_s26, 4  ;;  %s625_s27 = int_to_ptr.vmem [resolvable:$false] %s624_s27 }
  0x22   : > { %s626_s28 = scalar_lea.vmem %s625_s27, 512  ;;  %p627_p10 = scmp.lt.s32.totalorder %s797_s6, %s625_s27 }
  0x23   : > { %p622_p3 = pnand %p620_p1, %p606_p2  ;;  %p628_p5 = scmp.lt.s32.totalorder %s626_s28, %s619_s22 }
  0x25   : > { %p623_p11 = pneg %p622_p3  ;;  %p629_p7 = por %p628_p5, %p627_p10 }
  0x27   : > { %p630_p8 = pnand %p629_p7, %p623_p11 }
  0x29   : > { %633 = shalt.err (!%p630_p8)
}
  0x2a   : > { %560 = dma.hbm_to_vmem [thread:$0]  (!%p793_p12), %s789_s4, 256, %s797_s6, %s138_s8  }
  0x2b   : > { %p921_p13 = scmp.lt.s32.totalorder %s700_s15, 9  ;;  %p922_p0 = scmp.ge.s32.totalorder %s700_s15, 1 }
  0x2d   : > { %p155_p2 = pnand %p922_p0, %p921_p13 }
  0x2e   : > { %s831_s29 = sand.u32 (!%p155_p2), 1, %s692_s13  }
  0x2f   : > { %158 = sbr.rel (%p155_p2) target bundleno = 540 (0x21c), region = 32  ;;  %s531_s30 = sshll.u32 (!%p155_p2), %s831_s29, 4 }
  0x30   : > { %s161_s5 = scalar_lea.sflag (!%p155_p2), [#allocation3], %s831_s29  ;;  %s164_s9 = scalar_lea.vmem (!%p155_p2), [#allocation2], %s531_s30 }
  0x36   : > { %679 = dma.done.wait (%p770_p6), %s161_s5, 256  }
  0x37   : > { %681 = vsyncadd (%p770_p6), %s161_s5, 4294967040  ;;  %v703_v0 = vmov 0.0   ;;  %v704_v1 = vmov 0   ;;  %vm212_vm0 = vcmask 1045504   ;;  %v194_v2 = vld [vmem:[%s164_s9 + $0x8] sm:$0x3f]  ;;  %v422_v46 = vlaneseq }
  0x38   : > { %283 = vmatprep.mubr.f32.mxu0 %v703_v0  ;;  %602 = vset.pattern.permute.xlu0 %v704_v1  ;;  %v193_v3 = vld [vmem:[%s164_s9] sm:$0x3f]  ;;  %vm205_vm1 = vcmask 48128   ;;  %v192_v6 = vld [vmem:[%s913_s2 + $0x8] sm:$0xff]  ;;  %vm309_vm2 = vcmask 130048   ;;  %s532_s9 = sshll.u32 %s831_s29, 1 }
  0x39   : > { %377 = vmatprep.mubr.f32.mxu1 %v703_v0  ;;  %603 = vset.pattern.permute.xlu1 %v704_v1  ;;  %v189_v4 = vld [vmem:[%s912_s1] sm:$0xff]  ;;  %v190_v7 = vld [vmem:[%s912_s1 + $0x8] sm:$0xff]  ;;  %v538_v9 = vld [vmem:[%s913_s2 + $0x10] sm:$0xff]  ;;  %v705_v44 = vmov 1966171168   ;;  %v423_v52 = vshrl.u32 %v422_v46, 7 }
  0x3a   : > { %533 = vmatprep.subr.msk.mxu0 %vm212_vm0, %v194_v2  ;;  %v191_v5 = vld [vmem:[%s913_s2] sm:$0xff]  ;;  %306 = vperm.xlu1 %603, %v538_v9   ;;  %v537_v27 = vld [vmem:[%s912_s1 + $0x10] sm:$0xff]  ;;  %v420_v45 = vunpack.c.l.s4 %v705_v44  ;;  %s548_s4 = sshll.u32 %s748_s16, 5  ;;  %s186_s6 = scalar_lea.vmem [#allocation5], %s532_s9  ;;  %vm436_vm3 = vcmp.lt.s32.totalorder %v422_v46, 256 }
  0x3b   : > { %534 = vmatpush1.msk.msra.mxu0 %vm212_vm0, %v193_v3  ;;  %197 = vperm.xlu0 %602, %v191_v5   ;;  %v541_v8 = vld [vmem:[%s913_s2 + $0x20] sm:$0x1]  ;;  %s454_s7 = sshll.u32 %s186_s6, 4  ;;  %s868_s10 = scalar_lea.hbm %s914_s3, %s548_s4  ;;  %s870_s7 = int_to_ptr.vmem [resolvable:$true] %s454_s7 }
  0x3c   : > { %535 = vmatmul.mubr.msk.f32.vlgmr.msra.gmra.mrb[0].mxu0 %vm205_vm1, %v189_v4  ;;  %v540_v10 = vld [vmem:[%s912_s1 + $0x20] sm:$0xff]  ;;  %v421_v51 = vunpack.c.0.s8 %v420_v45  ;;  %s440_s11 = scalar_lea.sflag [#allocation4], %s831_s29  ;;  %s634_s17 = scalar_lea.vmem %s870_s7, 32 }
  0x3d   : > { %289 = vmatprep.mubr.f32.mxu0 %v703_v0  ;;  %p635_p6 = scmp.ne.s32.totalorder %s870_s7, %s634_s17  ;;  %p923_p10 = scmp.ne.s32.totalorder %s918_s24, 0 }
  0x3e   : > { %392 = vperm.xlu1 %603, %v540_v10   ;;  %v424_v58 = vsub.s32 %v421_v51, %v423_v52  ;;  %s706_s16 = smov [#allocation5]  }
  0x3f   : > { %202 = vperm.xlu0 %602, %v192_v6   ;;  %p636_p11 = pnand %p635_p6, %p923_p10  ;;  %s638_s19 = sshll.u32 %s706_s16, 4  ;;  %s639_s19 = int_to_ptr.vmem [resolvable:$false] %s638_s19 }
  0x40   : > { %536 = vmatmul.mubr.msk.f32.gmra.mrb[2].mxu0 %vm205_vm1, %v190_v7  ;;  %s640_s20 = scalar_lea.vmem %s639_s19, 64  ;;  %p641_p4 = scmp.lt.s32.totalorder %s870_s7, %s639_s19 }
  0x41   : > { %p637_p12 = pneg %p636_p11  ;;  %p642_p9 = scmp.lt.s32.totalorder %s640_s20, %s634_s17 }
  0x43   : > { %411 = vperm.xlu0 %602, %v541_v8   ;;  %p643_p1 = por %p642_p9, %p641_p4 }
  0x45   : > { %p644_p3 = pnand %p643_p1, %p637_p12 }
  0xb9   : > { %v307_v28 = vpop.permute.xlu1 %306 }
  0xba   : > { %v198_v11 = vpop.permute.xlu0 %197 }
  0xbd   : > { %v393_v34 = vpop.permute.xlu1 %392 }
  0xbe   : > { %v203_v15 = vpop.permute.xlu0 %202 }
  0xc2   : > { %v412_v54 = vpop.permute.xlu0 %411 }
 0x10f   : > { %v285_v12 = vpop.f32.mrb[0].mxu0 }
 0x110   : > { %v287_v13 = vpop.f32.mrb[1].mxu0  ;;  %v286_v14 = vadd.f32 %v285_v12, %v198_v11 }
 0x111   : > { %v288_v16 = vadd.f32 %v287_v13, %v198_v11 }
 0x112   : > { %v296_v21 = vmax.f32 %v286_v14, 0.0 }
 0x113   : > { %v291_v17 = vpop.f32.mrb[2].mxu0  ;;  %v297_v23 = vmax.f32 %v288_v16, 0.0 }
 0x114   : > { %v292_v18 = vadd.f32 %v291_v17, %v203_v15  ;;  %v293_v19 = vpop.f32.mrb[3].mxu0 }
 0x115   : > { %v294_v20 = vadd.f32 %v293_v19, %v203_v15 }
 0x116   : > { %v298_v22 = vmax.f32 %v292_v18, 0.0 }
 0x117   : > { %v299_v24 = vmax.f32 %v294_v20, 0.0 }
 0x118   : > { %v551_v25 = vpack.c.bf16 %v298_v22, %v296_v21 }
 0x119   : > { %v549_v26 = vpack.c.bf16 %v299_v24, %v297_v23 }
 0x11b   : > { %550 = vmatprep.subr.bf16.mxu1 %v549_v26 }
 0x11c   : > { %552 = vmatpush1.bf16.msra.mxu1 %v551_v25 }
 0x11f   : > { %539 = vmatmul.mubr.msk.f32.vlgmr.msra.gmra.mrb[0].mxu1 %vm309_vm2, %v537_v27 }
 0x1f2   : > { %v379_v29 = vpop.f32.mrb[0].mxu1 }
 0x1f3   : > { %v380_v30 = vadd.f32 %v379_v29, %v307_v28  ;;  %v381_v31 = vpop.f32.mrb[1].mxu1 }
 0x1f4   : > { %v382_v32 = vadd.f32 %v381_v31, %v307_v28 }
 0x1f5   : > { %v384_v33 = vmax.f32 %v380_v30, 0.0 }
 0x1f6   : > { %v385_v35 = vmax.f32 %v382_v32, 0.0 }
 0x1f7   : > { %v395_v36 = vmul.f32 %v393_v34, %v384_v33 }
 0x1f8   : > { %v396_v37 = vmul.f32 %v393_v34, %v385_v35 }
 0x1f9   : > { %v397_v38 = vrot.slane %v395_v36, 4 }
 0x1fa   : > { %v403_v39 = vrot.slane %v396_v37, 4 }
 0x1fb   : > { %v398_v40 = vadd.f32 %v397_v38, %v395_v36 }
 0x1fc   : > { %v404_v41 = vadd.f32 %v403_v39, %v396_v37 }
 0x1fd   : > { %v399_v42 = vrot.slane %v398_v40, 2 }
 0x1fe   : > { %v405_v43 = vrot.slane %v404_v41, 2 }
 0x1ff   : > { %v400_v47 = vadd.f32 %v399_v42, %v398_v40 }
 0x200   : > { %v406_v48 = vadd.f32 %v405_v43, %v404_v41 }
 0x201   : > { %v401_v49 = vrot.slane %v400_v47, 1 }
 0x202   : > { %v407_v50 = vrot.slane %v406_v48, 1 }
 0x203   : > { %v402_v53 = vadd.f32 %v401_v49, %v400_v47 }
 0x204   : > { %v408_v55 = vadd.f32 %v407_v50, %v406_v48 }
 0x205   : > { %v414_v56 = vadd.f32 %v412_v54, %v402_v53 }
 0x206   : > { %v415_v57 = vadd.f32 %v412_v54, %v408_v55 }
 0x208   : > { %v418_v59 = vcombine.low %v414_v56, %v415_v57 }
 0x20a   : > { %v425_v60 = vrot.slane %v418_v59, %v424_v58 }
 0x20c   : > { %v432_v61 = vrot.slane %v425_v60, %v424_v58 }
 0x20e   : > { %438 = vst.msk [vmem:[%s186_s6] sm:$0x3] %vm436_vm3, %v432_v61 }
 0x20f   : > { %647 = shalt.err (!%p644_p3)
}
 0x210   : > { %s648_s29 = scalar_lea.hbm %s868_s10, 32  ;;  %s652_s27 = scalar_lea.hbm %s914_s3, 256 }
 0x211   : > { %p649_p5 = scmp.ne.s32.totalorder %s868_s10, %s648_s29  ;;  %p653_p13 = scmp.lt.u32.totalorder %s868_s10, %s914_s3 }
 0x212   : > { %p654_p0 = scmp.lt.u32.totalorder %s652_s27, %s648_s29  ;;  %p656_p6 = scmp.lt.u32.totalorder %s648_s29, %s868_s10 }
 0x213   : > { %p650_p7 = pnand %p649_p5, %p923_p10 }
 0x214   : > { %p655_p2 = por %p654_p0, %p653_p13 }
 0x215   : > { %p651_p8 = pneg %p650_p7 }
 0x216   : > { %p657_p11 = por %p656_p6, %p655_p2 }
 0x218   : > { %p658_p12 = pnand %p657_p11, %p651_p8 }
 0x21a   : > { %661 = shalt.err (!%p658_p12)
}
 0x21b   : > { %555 = dma.vmem_to_hbm [thread:$0]  (%p923_p10), %s870_s7, 32, %s868_s10, %s440_s11  }
 0x21c PF: > { %p566_p4 = scmp.ge.s32.totalorder %s700_s15, 2  ;;  %s466_s5 = sand.u32 1, %s688_s12  }
 0x21d   : > { %p924_p9 = scmp.ne.s32.totalorder %s919_s25, 0  ;;  %s467_s9 = scalar_lea.sflag [#allocation4], %s466_s5 }
 0x21f   : > { %p562_p1 = pnand %p566_p4, %p924_p9 }
 0x221   : > { %683 = dma.done.wait (!%p562_p1), %s467_s9, 32  }
 0x222   : > { %685 = vsyncadd (!%p562_p1), %s467_s9, 4294967264  ;;  %p16_p3 = scmp.ge.s32.totalorder %s752_s18, 10   ;;  %s925_s12 = smov %s692_s13 }
 0x223   : > { %s926_s13 = smov %s696_s14  ;;  %s927_s14 = smov %s764_s21 }
 0x224   : > { %s928_s15 = smov %s752_s18  ;;  %18 = sbr.rel (!%p16_p3) target bundleno = 5 (0x5), region = 81 }
 0x22b   :  { %472 = vsyncpa [#allocation3], 1 }
 0x22c   :  { %474 = vsyncpa [#allocation3 + $0x1], 1 }
 0x22d   :  { %475 = vsyncpa [#allocation4], 1 }
 0x22e   :  { %477 = vsyncpa [#allocation4 + $0x1], 1 }

</bundles_post_ra>
